<compile_context>
chip_gen: v7x
topology: tpu7x:2x2x1
jax: 0.10.0
libtpu: 0.0.40
codegen_flags: <defaults>
</compile_context>

<pallas_src>
import math

import jax
import jax.numpy as jnp
from jax.experimental import pallas as pl
from jax.experimental.pallas import tpu as pltpu


def _round_up(x, m):
    return ((x + m - 1) // m) * m


def _coord_linear_kernel(qoh_ref, coords_ref, e_ref, wf_ref, b_ref, o_ref):
    """out = (qoh @ E * sigmoid(coords)) @ W_flat + qoh @ B   (all-f32 compute)."""
    qoh = qoh_ref[...].astype(jnp.float32)                                   # (tm, C)
    # Expand the per-chart gate across each chart's dim_z columns with a tiny
    # MXU dot against the constant 0/1 expansion matrix E (C, K). This replaces
    # the old HBM-streamed duplicate of the coords stream.
    gate = jnp.dot(qoh, e_ref[...], preferred_element_type=jnp.float32)      # (tm, K)
    x = gate * jax.nn.sigmoid(coords_ref[...].astype(jnp.float32))           # (tm, K)
    acc = jnp.dot(x, wf_ref[...], preferred_element_type=jnp.float32)        # (tm, O)
    acc = acc + jnp.dot(qoh, b_ref[...], preferred_element_type=jnp.float32)
    o_ref[...] = acc.astype(o_ref.dtype)


def prepare_coord_linear_params(weights, biases):
    """Per-model constants. Hoist/cache this across forward calls so the weight
    transpose/reshape/pad is not re-materialized every call."""
    n_charts, out_dim, dim_z = weights.shape
    K = n_charts * dim_z
    # Lane-dense (128-multiple) output only when out_dim is already >= 128; for
    # small out_dim that padding would inflate HBM writeback 4-6x.
    out_pad = _round_up(out_dim, 128) if out_dim >= 128 else out_dim
    # W_flat[c*dim_z + d, o] = weights[c, o, d]
    wf = jnp.transpose(weights, (0, 2, 1)).reshape(K, out_dim).astype(jnp.float32)
    b = biases.astype(jnp.float32)                                           # (C, out_dim)
    if out_pad != out_dim:
        wf = jnp.pad(wf, ((0, 0), (0, out_pad - out_dim)))
        b = jnp.pad(b, ((0, 0), (0, out_pad - out_dim)))
    # Chart -> flattened-K expansion matrix: E[c, c*dim_z + d] = 1
    e = jnp.repeat(jnp.eye(n_charts, dtype=jnp.float32), dim_z, axis=1)      # (C, K)
    return wf, b, e, out_dim, out_pad


def coord_linear(q, coords, weights, biases, one_hot_q=True, *,
                 row_tile=1024, stream_dtype=jnp.bfloat16, min_grid_steps=2,
                 prepared=None):
    """q: [n, n_charts], coords: [n, n_charts, dim_z],
    weights: [n_charts, out_dim, dim_z], biases: [n_charts, out_dim].
    Returns [n, out_dim] float32."""
    n, n_charts = q.shape
    dim_z = coords.shape[-1]
    K = n_charts * dim_z

    if prepared is None:
        prepared = prepare_coord_linear_params(weights, biases)
    wf, b, e, out_dim, out_pad = prepared

    # ---- glue (plain JAX): one-hot argmax + layout ----
    if one_hot_q:
        qoh = jax.nn.one_hot(jnp.argmax(q, axis=1), n_charts, dtype=jnp.float32)
    else:
        qoh = q.astype(jnp.float32)
    # Streamed activations in bf16 (halves the dominant HBM read); one-hot values
    # are exact in bf16, coords quantization error stays far below typical tolerances.
    qoh = qoh.astype(stream_dtype)
    coords_flat = coords.reshape(n, K).astype(stream_dtype)

    itemsize = jnp.dtype(stream_dtype).itemsize
    row_align = max(8, 32 // itemsize)          # 8 for f32, 16 for bf16 (sublane packing)

    # Row tile: big enough to amortize the ~0.35 us per-grid-step overhead, but
    # capped so the "parallel" axis has >= min_grid_steps steps (v7x has 2 TCs).
    tm = _round_up(max(1, -(-n // max(min_grid_steps, 1))), row_align)
    tm = max(row_align, min(tm, _round_up(row_tile, row_align)))
    n_pad = _round_up(n, tm)
    if n_pad != n:
        pad = ((0, n_pad - n), (0, 0))
        qoh = jnp.pad(qoh, pad)
        coords_flat = jnp.pad(coords_flat, pad)

    # Explicit VMEM budget (v5e scoped default is only 16 MiB); capped below
    # v7x's 64 MiB physical VMEM.
    per_step_bytes = (2 * tm * (K + n_charts) * itemsize      # double-buffered streamed inputs
                      + 2 * tm * out_pad * 4                  # double-buffered output
                      + (K * out_pad + n_charts * (out_pad + K)) * 4)  # resident constants
    vmem_limit = int(min(60 * 1024 * 1024, max(32 * 1024 * 1024, 2 * per_step_bytes)))

    def build_and_run(single_buffer_resident):
        # Constant-index operands gain nothing from double buffering; Buffered(1)
        # halves their resident VMEM footprint (matters for large K*out_pad on v7x).
        res_kw = dict(pipeline_mode=pl.Buffered(1)) if single_buffer_resident else {}
        grid_spec = pltpu.PrefetchScalarGridSpec(
            num_scalar_prefetch=0,
            grid=(n_pad // tm,),
            in_specs=[
                pl.BlockSpec((tm, n_charts), lambda i: (i, 0)),            # qoh     (streamed)
                pl.BlockSpec((tm, K), lambda i: (i, 0)),                   # coords  (streamed)
                pl.BlockSpec((n_charts, K), lambda i: (0, 0), **res_kw),   # E       (resident)
                pl.BlockSpec((K, out_pad), lambda i: (0, 0), **res_kw),    # W_flat  (resident)
                pl.BlockSpec((n_charts, out_pad), lambda i: (0, 0), **res_kw),  # B  (resident)
            ],
            out_specs=pl.BlockSpec((tm, out_pad), lambda i: (i, 0)),
        )
        return pl.pallas_call(
            _coord_linear_kernel,
            out_shape=jax.ShapeDtypeStruct((n_pad, out_pad), jnp.float32),
            grid_spec=grid_spec,
            compiler_params=pltpu.CompilerParams(
                dimension_semantics=("parallel",),
                vmem_limit_bytes=vmem_limit),
        )(qoh, coords_flat, e, wf, b)

    try:
        out = build_and_run(True)
    except Exception:
        # Fallback for jax versions that reject Buffered(1); only the
        # resident-constant VMEM footprint doubles, correctness unaffected.
        out = build_and_run(False)

    return out[:n, :out_dim]


def coord_linear_ref(q, coords, weights, biases, one_hot_q=True):
    """Pure-JAX reference mirroring the PyTorch forward."""
    coords = jax.nn.sigmoid(coords)
    if one_hot_q:
        q = jax.nn.one_hot(jnp.argmax(q, axis=1), q.shape[1], dtype=jnp.float32)
    ret = jnp.einsum("cod,ncd->nco", weights, coords) + biases[None, :, :]
    return jnp.sum(q[:, :, None] * ret, axis=1)


def _make_inputs(key, n, n_charts, dim_z, out_dim):
    k_q, k_c, k_w, k_b = jax.random.split(key, 4)
    # Mimic reset_parameters(): kaiming_uniform_(a=sqrt(5)) on a 3D tensor ->
    # U(-1/sqrt(fan_in), 1/sqrt(fan_in)) with fan_in = out_dim * dim_z; biases likewise.
    fan_in = out_dim * dim_z
    bound = 1.0 / math.sqrt(fan_in)
    weights = jax.random.uniform(k_w, (n_charts, out_dim, dim_z),
                                 minval=-bound, maxval=bound, dtype=jnp.float32)
    biases = jax.random.uniform(k_b, (n_charts, out_dim),
                                minval=-bound, maxval=bound, dtype=jnp.float32)
    q = jax.random.normal(k_q, (n, n_charts), dtype=jnp.float32)
    coords = jax.random.normal(k_c, (n, n_charts, dim_z), dtype=jnp.float32)
    return q, coords, weights, biases


if __name__ == "__main__":
    key = jax.random.PRNGKey(0)
    k1, k2, k3 = jax.random.split(key, 3)

    # (key, n, n_charts, dim_z, out_dim, streamed activation dtype)
    cases = [
        (k1, 8, 4, 8, 32, jnp.float32),     # exact-f32 path, tight tolerance
        (k2, 50, 3, 5, 20, jnp.bfloat16),   # bf16 streaming, row tiling, small (unpadded) out_dim
        (k3, 33, 4, 6, 128, jnp.bfloat16),  # lane-dense (>=128) output path
    ]
    for k, n, n_charts, dim_z, out_dim, sdt in cases:
        q, coords, weights, biases = _make_inputs(k, n, n_charts, dim_z, out_dim)
        prepared = prepare_coord_linear_params(weights, biases)   # cacheable constants
        out = coord_linear(q, coords, weights, biases, stream_dtype=sdt, prepared=prepared)
        out = jax.block_until_ready(out)
        assert out.shape == (n, out_dim)

        ref_exact = coord_linear_ref(q, coords, weights, biases)
        if sdt == jnp.float32:
            assert jnp.allclose(out, ref_exact, atol=1e-5, rtol=1e-5), "f32 mismatch"
        else:
            # Kernel computes in f32 on bf16-stored coords: compare tightly against a
            # reference on the same quantized inputs, loosely against the exact one.
            coords_q = coords.astype(jnp.bfloat16).astype(jnp.float32)
            ref_q = coord_linear_ref(q, coords_q, weights, biases)
            assert jnp.allclose(out, ref_q, atol=1e-4, rtol=1e-4), "bf16-quantized mismatch"
            assert jnp.allclose(out, ref_exact, atol=2e-2, rtol=2e-2), "bf16 drift too large"

    print("KERNEL_OK")
</pallas_src>

<mosaic_0001>
module attributes {stable_mosaic.version = 11 : i64} {
  func.func @_coord_linear_kernel(%arg0: i32, %arg1: memref<8x4xf32, #tpu.memory_space<vmem>>, %arg2: memref<8x32xf32, #tpu.memory_space<vmem>>, %arg3: memref<4x32xf32, #tpu.memory_space<vmem>>, %arg4: memref<32x32xf32, #tpu.memory_space<vmem>>, %arg5: memref<4x32xf32, #tpu.memory_space<vmem>>, %arg6: memref<8x32xf32, #tpu.memory_space<vmem>>) attributes {dimension_semantics = [#tpu.dimension_semantics<parallel>], iteration_bounds = array<i64: 1>, scalar_prefetch = 0 : i64, scratch_operands = 0 : i64, tpu.core_type = #tpu.core_type<tc>, window_params = [{transform_indices = @transform_0, window_bounds = array<i64: 8, 4>}, {transform_indices = @transform_1, window_bounds = array<i64: 8, 32>}, {pipeline_mode = #tpu.pipeline_mode<synchronous>, transform_indices = @transform_2, window_bounds = array<i64: 4, 32>}, {pipeline_mode = #tpu.pipeline_mode<synchronous>, transform_indices = @transform_3, window_bounds = array<i64: 32, 32>}, {pipeline_mode = #tpu.pipeline_mode<synchronous>, transform_indices = @transform_4, window_bounds = array<i64: 4, 32>}, {transform_indices = @transform_5, window_bounds = array<i64: 8, 32>}]} {
    %c0 = arith.constant 0 : index
    %c0_0 = arith.constant 0 : index
    %0 = vector.load %arg1[%c0, %c0_0] : memref<8x4xf32, #tpu.memory_space<vmem>>, vector<8x4xf32>
    %c0_1 = arith.constant 0 : index
    %c0_2 = arith.constant 0 : index
    %1 = vector.load %arg3[%c0_1, %c0_2] : memref<4x32xf32, #tpu.memory_space<vmem>>, vector<4x32xf32>
    %cst = arith.constant dense<0.000000e+00> : vector<8x32xf32>
    %2 = tpu.matmul %0, %1, %cst {dimension_numbers = #tpu.dot_dimension_numbers<[1], [0], [0], [1], [0, 0, 1, 1], [], []>} : vector<8x4xf32>, vector<4x32xf32>, vector<8x32xf32> -> vector<8x32xf32>
    %c0_3 = arith.constant 0 : index
    %c0_4 = arith.constant 0 : index
    %3 = vector.load %arg2[%c0_3, %c0_4] : memref<8x32xf32, #tpu.memory_space<vmem>>, vector<8x32xf32>
    %4 = arith.negf %3 : vector<8x32xf32>
    %5 = math.exp %4 : vector<8x32xf32>
    %cst_5 = arith.constant 1.000000e+00 : f32
    %6 = vector.broadcast %cst_5 : f32 to vector<8x32xf32>
    %7 = arith.addf %6, %5 : vector<8x32xf32>
    %8 = arith.divf %6, %7 : vector<8x32xf32>
    %9 = arith.mulf %2, %8 : vector<8x32xf32>
    %c0_6 = arith.constant 0 : index
    %c0_7 = arith.constant 0 : index
    %10 = vector.load %arg4[%c0_6, %c0_7] : memref<32x32xf32, #tpu.memory_space<vmem>>, vector<32x32xf32>
    %cst_8 = arith.constant dense<0.000000e+00> : vector<8x32xf32>
    %11 = tpu.matmul %9, %10, %cst_8 {dimension_numbers = #tpu.dot_dimension_numbers<[1], [0], [0], [1], [0, 0, 1, 1], [], []>} : vector<8x32xf32>, vector<32x32xf32>, vector<8x32xf32> -> vector<8x32xf32>
    %c0_9 = arith.constant 0 : index
    %c0_10 = arith.constant 0 : index
    %12 = vector.load %arg5[%c0_9, %c0_10] : memref<4x32xf32, #tpu.memory_space<vmem>>, vector<4x32xf32>
    %cst_11 = arith.constant dense<0.000000e+00> : vector<8x32xf32>
    %13 = tpu.matmul %0, %12, %cst_11 {dimension_numbers = #tpu.dot_dimension_numbers<[1], [0], [0], [1], [0, 0, 1, 1], [], []>} : vector<8x4xf32>, vector<4x32xf32>, vector<8x32xf32> -> vector<8x32xf32>
    %14 = arith.addf %11, %13 : vector<8x32xf32>
    %c0_12 = arith.constant 0 : index
    %c0_13 = arith.constant 0 : index
    %15 = vector.load %arg6[%c0_12, %c0_13] : memref<8x32xf32, #tpu.memory_space<vmem>>, vector<8x32xf32>
    tpu.vector_store %arg6[%c0_12, %c0_13], %14 {strides = array<i32>} : memref<8x32xf32, #tpu.memory_space<vmem>>, vector<8x32xf32>,
    return
  }
  func.func @transform_0(%arg0: i32) -> (i32, i32) {
    %c0_i32 = arith.constant 0 : i32
    %c0_i32_0 = arith.constant 0 : i32
    return %arg0, %c0_i32 : i32, i32
  }
  func.func @transform_1(%arg0: i32) -> (i32, i32) {
    %c0_i32 = arith.constant 0 : i32
    %c0_i32_0 = arith.constant 0 : i32
    return %arg0, %c0_i32 : i32, i32
  }
  func.func @transform_2(%arg0: i32) -> (i32, i32) {
    %c0_i32 = arith.constant 0 : i32
    %c0_i32_0 = arith.constant 0 : i32
    %c0_i32_1 = arith.constant 0 : i32
    return %c0_i32, %c0_i32_0 : i32, i32
  }
  func.func @transform_3(%arg0: i32) -> (i32, i32) {
    %c0_i32 = arith.constant 0 : i32
    %c0_i32_0 = arith.constant 0 : i32
    %c0_i32_1 = arith.constant 0 : i32
    return %c0_i32, %c0_i32_0 : i32, i32
  }
  func.func @transform_4(%arg0: i32) -> (i32, i32) {
    %c0_i32 = arith.constant 0 : i32
    %c0_i32_0 = arith.constant 0 : i32
    %c0_i32_1 = arith.constant 0 : i32
    return %c0_i32, %c0_i32_0 : i32, i32
  }
  func.func @transform_5(%arg0: i32) -> (i32, i32) {
    %c0_i32 = arith.constant 0 : i32
    %c0_i32_0 = arith.constant 0 : i32
    return %arg0, %c0_i32 : i32, i32
  }
}

module attributes {stable_mosaic.version = 11 : i64} {
  func.func @_coord_linear_kernel(%arg0: i32, %arg1: memref<8x4xf32, #tpu.memory_space<vmem>>, %arg2: memref<8x32xf32, #tpu.memory_space<vmem>>, %arg3: memref<4x32xf32, #tpu.memory_space<vmem>>, %arg4: memref<32x32xf32, #tpu.memory_space<vmem>>, %arg5: memref<4x32xf32, #tpu.memory_space<vmem>>, %arg6: memref<8x32xf32, #tpu.memory_space<vmem>>) attributes {dimension_semantics = [#tpu.dimension_semantics<parallel>], iteration_bounds = array<i64: 1>, scalar_prefetch = 0 : i64, scratch_operands = 0 : i64, tpu.core_type = #tpu.core_type<tc>, window_params = [{transform_indices = @transform_0, window_bounds = array<i64: 8, 4>}, {transform_indices = @transform_1, window_bounds = array<i64: 8, 32>}, {pipeline_mode = #tpu.pipeline_mode<synchronous>, transform_indices = @transform_2, window_bounds = array<i64: 4, 32>}, {pipeline_mode = #tpu.pipeline_mode<synchronous>, transform_indices = @transform_3, window_bounds = array<i64: 32, 32>}, {pipeline_mode = #tpu.pipeline_mode<synchronous>, transform_indices = @transform_4, window_bounds = array<i64: 4, 32>}, {transform_indices = @transform_5, window_bounds = array<i64: 8, 32>}]} {
    %c0 = arith.constant 0 : index
    %c0_0 = arith.constant 0 : index
    %0 = vector.load %arg1[%c0, %c0_0] : memref<8x4xf32, #tpu.memory_space<vmem>>, vector<8x4xf32>
    %c0_1 = arith.constant 0 : index
    %c0_2 = arith.constant 0 : index
    %1 = vector.load %arg3[%c0_1, %c0_2] : memref<4x32xf32, #tpu.memory_space<vmem>>, vector<4x32xf32>
    %cst = arith.constant dense<0.000000e+00> : vector<8x32xf32>
    %2 = tpu.matmul %0, %1, %cst {dimension_numbers = #tpu.dot_dimension_numbers<[1], [0], [0], [1], [0, 0, 1, 1], [], []>} : vector<8x4xf32>, vector<4x32xf32>, vector<8x32xf32> -> vector<8x32xf32>
    %c0_3 = arith.constant 0 : index
    %c0_4 = arith.constant 0 : index
    %3 = vector.load %arg2[%c0_3, %c0_4] : memref<8x32xf32, #tpu.memory_space<vmem>>, vector<8x32xf32>
    %4 = arith.negf %3 : vector<8x32xf32>
    %5 = math.exp %4 : vector<8x32xf32>
    %cst_5 = arith.constant 1.000000e+00 : f32
    %6 = vector.broadcast %cst_5 : f32 to vector<8x32xf32>
    %7 = arith.addf %6, %5 : vector<8x32xf32>
    %8 = arith.divf %6, %7 : vector<8x32xf32>
    %9 = arith.mulf %2, %8 : vector<8x32xf32>
    %c0_6 = arith.constant 0 : index
    %c0_7 = arith.constant 0 : index
    %10 = vector.load %arg4[%c0_6, %c0_7] : memref<32x32xf32, #tpu.memory_space<vmem>>, vector<32x32xf32>
    %cst_8 = arith.constant dense<0.000000e+00> : vector<8x32xf32>
    %11 = tpu.matmul %9, %10, %cst_8 {dimension_numbers = #tpu.dot_dimension_numbers<[1], [0], [0], [1], [0, 0, 1, 1], [], []>} : vector<8x32xf32>, vector<32x32xf32>, vector<8x32xf32> -> vector<8x32xf32>
    %c0_9 = arith.constant 0 : index
    %c0_10 = arith.constant 0 : index
    %12 = vector.load %arg5[%c0_9, %c0_10] : memref<4x32xf32, #tpu.memory_space<vmem>>, vector<4x32xf32>
    %cst_11 = arith.constant dense<0.000000e+00> : vector<8x32xf32>
    %13 = tpu.matmul %0, %12, %cst_11 {dimension_numbers = #tpu.dot_dimension_numbers<[1], [0], [0], [1], [0, 0, 1, 1], [], []>} : vector<8x4xf32>, vector<4x32xf32>, vector<8x32xf32> -> vector<8x32xf32>
    %14 = arith.addf %11, %13 : vector<8x32xf32>
    %c0_12 = arith.constant 0 : index
    %c0_13 = arith.constant 0 : index
    %15 = vector.load %arg6[%c0_12, %c0_13] : memref<8x32xf32, #tpu.memory_space<vmem>>, vector<8x32xf32>
    tpu.vector_store %arg6[%c0_12, %c0_13], %14 {strides = array<i32>} : memref<8x32xf32, #tpu.memory_space<vmem>>, vector<8x32xf32>,
    return
  }
  func.func @transform_0(%arg0: i32) -> (i32, i32) {
    %c0_i32 = arith.constant 0 : i32
    %c0_i32_0 = arith.constant 0 : i32
    return %arg0, %c0_i32 : i32, i32
  }
  func.func @transform_1(%arg0: i32) -> (i32, i32) {
    %c0_i32 = arith.constant 0 : i32
    %c0_i32_0 = arith.constant 0 : i32
    return %arg0, %c0_i32 : i32, i32
  }
  func.func @transform_2(%arg0: i32) -> (i32, i32) {
    %c0_i32 = arith.constant 0 : i32
    %c0_i32_0 = arith.constant 0 : i32
    %c0_i32_1 = arith.constant 0 : i32
    return %c0_i32, %c0_i32_0 : i32, i32
  }
  func.func @transform_3(%arg0: i32) -> (i32, i32) {
    %c0_i32 = arith.constant 0 : i32
    %c0_i32_0 = arith.constant 0 : i32
    %c0_i32_1 = arith.constant 0 : i32
    return %c0_i32, %c0_i32_0 : i32, i32
  }
  func.func @transform_4(%arg0: i32) -> (i32, i32) {
    %c0_i32 = arith.constant 0 : i32
    %c0_i32_0 = arith.constant 0 : i32
    %c0_i32_1 = arith.constant 0 : i32
    return %c0_i32, %c0_i32_0 : i32, i32
  }
  func.func @transform_5(%arg0: i32) -> (i32, i32) {
    %c0_i32 = arith.constant 0 : i32
    %c0_i32_0 = arith.constant 0 : i32
    return %arg0, %c0_i32 : i32, i32
  }
}

</mosaic_0001>

<bundles_post_ra>
// kernel: tpu_custom_call.1
= control target key start
LH: loop header
LB: loop body
LE: loop exit
PB: predicated region body
PF: predicated region fallthrough
CT: control target
= control target key end

     0   :  { %10 = vsyncpa [#allocation3], 0  ;;  %s469_s0 = inlined_call_operand.vmem [shape: f32[8,4], index: 0, kind: input, shape index: {}]   ;;  %s470_s1 = inlined_call_operand.vmem [shape: f32[8,32], index: 1, kind: input, shape index: {}]   ;;  %s471_s2 = inlined_call_operand.vmem [shape: f32[4,32], index: 2, kind: input, shape index: {}]   ;;  %s472_s3 = inlined_call_operand.hbm [shape: f32[32,32], index: 3, kind: input, shape index: {}]   ;;  %s473_s4 = inlined_call_operand.vmem [shape: f32[4,32], index: 4, kind: input, shape index: {}]   ;;  %s474_s5 = inlined_call_operand.hbm [shape: f32[8,32], index: 5, kind: output, shape index: {}]  }
   0x1   :  { %11 = vsyncpa [#allocation4], 0  ;;  %s393_s18 = smov [#allocation2]   ;;  %s345_s22 = scalar_lea.hbm %s472_s3, 512 }
   0x2   :  { %s23_s19 = sshll.u32 %s393_s18, 4  ;;  %p346_p0 = scmp.ne.s32.totalorder %s472_s3, %s345_s22  ;;  %s24_s19 = int_to_ptr.vmem [resolvable:$true] %s23_s19 }
   0x3   :  { %p349_p1 = scmp.lt.u32.totalorder %s345_s22, %s472_s3 }
   0x5   :  { %p351_p2 = pnand %p349_p1, %p346_p0 }
   0x7   :  { %354 = shalt.err (!%p351_p2)
}
   0x8   :  { %s355_s27 = scalar_lea.vmem %s24_s19, 512  ;;  %p360_p4 = scmp.lt.s32.totalorder %s24_s19, %s24_s19 }
   0x9   :  { %p356_p3 = scmp.ne.s32.totalorder %s24_s19, %s355_s27  ;;  %p361_p5 = scmp.lt.s32.totalorder %s355_s27, %s355_s27 }
   0xb   :  { %p362_p6 = por %p361_p5, %p360_p4 }
   0xd   :  { %p363_p7 = pnand %p362_p6, %p356_p3 }
   0xf   :  { %366 = shalt.err (!%p363_p7)
}
  0x10   :  { %s394_s28 = smov 128   ;;  %s395_s29 = smov 8  }
  0x11   :  { %29 = dma.hbm_to_vmem [thread:$0]  %s472_s3, 512, %s24_s19, [#allocation3], %s394_s28, %s394_s28, %s395_s29  }
  0x12   :  { %389 = dma.done.wait [#allocation3], 512  }
  0x13   :  { %390 = vsyncadd [#allocation3], 4294966784  ;;  %v396_v0 = vmov 0.0   ;;  %vm397_vm0 = vmmov 0   ;;  %v398_v1 = vmov 0.0|0.0   ;;  %vm41_vm1 = vcmask 1043456  }
  0x14   :  { %306 = vmatprep.subr.mxu0 %v396_v0  ;;  %308 = vmatprep.mubr.msk.f32.mxu0 %vm397_vm0, %v396_v0  ;;  %vm37_vm2 = vcmask 31744   ;;  %v36_v2 = vld [vmem:[%s471_s2] sm:$0xf]  ;;  %v123_v4 = vld [vmem:[#allocation2] sm:$0xff]  ;;  %v124_v5 = vld [vmem:[#allocation2 + $0x8] sm:$0xff]  ;;  %vm201_vm3 = vcmask 261120  }
  0x15   :  { %327 = vmatprep.subr.bf16.mxu1 %v398_v1  ;;  %324 = vmatprep.mubr.msk.f32.mxu1 %vm397_vm0, %v396_v0  ;;  %v35_v3 = vld [vmem:[%s469_s0] sm:$0xff]  ;;  %v328_v7 = vpack.c.bf16 %v124_v5, %v123_v4  ;;  %v125_v8 = vld [vmem:[#allocation2 + $0x10] sm:$0xff] }
  0x16   :  { %307 = vmatpush3.msk.msra.mxu0 %vm41_vm1, %v36_v2  ;;  %v127_v6 = vld [vmem:[%s473_s4] sm:$0xf]  ;;  %s399_s4 = smov [#allocation5]  }
  0x17   :  { %309 = vmatmul.mubr.msk.f32.vlgmr.msra.gmra.mrb[0].mxu0 %vm37_vm2, %v35_v3  ;;  %311 = vmatprep.subr.mxu0 %v396_v0  ;;  %v126_v9 = vld [vmem:[#allocation2 + $0x18] sm:$0xff]  ;;  %s282_s12 = sshll.u32 %s399_s4, 4  ;;  %s283_s12 = int_to_ptr.vmem [resolvable:$true] %s282_s12 }
  0x18   :  { %312 = vmatpush3.msk.msra.mxu0 %vm41_vm1, %v127_v6  ;;  %313 = vmatprep.mubr.msk.f32.mxu0 %vm397_vm0, %v396_v0  ;;  %v331_v10 = vpack.c.bf16 %v126_v9, %v125_v8  ;;  %v115_v11 = vld [vmem:[%s470_s1] sm:$0xff]  ;;  %s367_s1 = scalar_lea.vmem %s283_s12, 128  ;;  %p372_p9 = scmp.lt.s32.totalorder %s283_s12, %s283_s12 }
  0x19   :  { %329 = vmatpush3.bf16.msra.mxu1 %v328_v7  ;;  %v293_v12 = vmul.f32 -1.442695, %v115_v11  ;;  %p368_p8 = scmp.ne.s32.totalorder %s283_s12, %s367_s1  ;;  %p373_p10 = scmp.lt.s32.totalorder %s367_s1, %s367_s1 }
  0x1a   :  { %330 = vmatprep.subr.bf16.mxu1 %v398_v1 }
  0x1b   :  { %314 = vmatmul.mubr.msk.f32.vlgmr.msra.gmra.mrb[2].mxu0 %vm37_vm2, %v35_v3  ;;  %341 = vpow2.f32 %v293_v12  ;;  %p374_p11 = por %p373_p10, %p372_p9 }
  0x1d   :  { %332 = vmatpush3.bf16.msra.mxu1 %v331_v10  ;;  %p375_p12 = pnand %p374_p11, %p368_p8 }
  0x25   :  { %v342_v13 = vpop.eup %341 }
  0x26   :  { %v119_v14 = vadd.f32 1.0, %v342_v13 }
  0x28   :  { %343 = vrcp.f32 %v119_v14 }
  0x32   :  { %v344_v15 = vpop.eup %343 }
  0xea   :  { %v111_v16 = vpop.f32.mrb[0].mxu0 }
  0xeb   :  { %v122_v17 = vmul.f32 %v344_v15, %v111_v16  ;;  %v310_v18 = vpop.f32.mrb[1].mxu0 }
  0xed   :  { %325 = vmatmul.mubr.msk.f32.vlgmr.msra.gmra.mrb[0].mxu1 %vm201_vm3, %v122_v17 }
  0xee   :  { %v197_v19 = vpop.f32.mrb[2].mxu0 }
  0xef   :  { %v315_v20 = vpop.f32.mrb[3].mxu0 }
 0x1c0   :  { %v271_v21 = vpop.f32.mrb[0].mxu1 }
 0x1c1   :  { %v272_v22 = vadd.f32 %v271_v21, %v197_v19  ;;  %v326_v23 = vpop.f32.mrb[1].mxu1 }
 0x1c3   :  { %275 = vst.msk [vmem:[#allocation5] sm:$0xff] %vm201_vm3, %v272_v22 }
 0x1c4   :  { %378 = shalt.err (!%p375_p12)
}
 0x1c5   :  { %s379_s15 = scalar_lea.hbm %s474_s5, 128 }
 0x1c6   :  { %p380_p13 = scmp.ne.s32.totalorder %s474_s5, %s379_s15  ;;  %p383_p0 = scmp.lt.u32.totalorder %s379_s15, %s474_s5 }
 0x1c8   :  { %p385_p1 = pnand %p383_p0, %p380_p13 }
 0x1ca   :  { %388 = shalt.err (!%p385_p1)
}
 0x1cb   :  { %285 = dma.vmem_to_hbm [thread:$0]  %s283_s12, 128, %s474_s5, [#allocation4]  }
 0x1cc   :  { %391 = dma.done.wait [#allocation4], 128  }
 0x1cd   :  { %392 = vsyncadd [#allocation4], 4294967168 }
 0x1ce   :  { %289 = vsyncpa [#allocation3], 1 }
 0x1cf   :  { %290 = vsyncpa [#allocation4], 1 }

// kernel: tpu_custom_call.1
= control target key start
LH: loop header
LB: loop body
LE: loop exit
PB: predicated region body
PF: predicated region fallthrough
CT: control target
= control target key end

     0   :  { %10 = vsyncpa [#allocation3], 0  ;;  %s469_s0 = inlined_call_operand.vmem [shape: f32[8,4], index: 0, kind: input, shape index: {}]   ;;  %s470_s1 = inlined_call_operand.vmem [shape: f32[8,32], index: 1, kind: input, shape index: {}]   ;;  %s471_s2 = inlined_call_operand.vmem [shape: f32[4,32], index: 2, kind: input, shape index: {}]   ;;  %s472_s3 = inlined_call_operand.hbm [shape: f32[32,32], index: 3, kind: input, shape index: {}]   ;;  %s473_s4 = inlined_call_operand.vmem [shape: f32[4,32], index: 4, kind: input, shape index: {}]   ;;  %s474_s5 = inlined_call_operand.hbm [shape: f32[8,32], index: 5, kind: output, shape index: {}]  }
   0x1   :  { %11 = vsyncpa [#allocation4], 0  ;;  %s393_s18 = smov [#allocation2]   ;;  %s345_s22 = scalar_lea.hbm %s472_s3, 512 }
   0x2   :  { %s23_s19 = sshll.u32 %s393_s18, 4  ;;  %p346_p0 = scmp.ne.s32.totalorder %s472_s3, %s345_s22  ;;  %s24_s19 = int_to_ptr.vmem [resolvable:$true] %s23_s19 }
   0x3   :  { %p349_p1 = scmp.lt.u32.totalorder %s345_s22, %s472_s3 }
   0x5   :  { %p351_p2 = pnand %p349_p1, %p346_p0 }
   0x7   :  { %354 = shalt.err (!%p351_p2)
}
   0x8   :  { %s355_s27 = scalar_lea.vmem %s24_s19, 512  ;;  %p360_p4 = scmp.lt.s32.totalorder %s24_s19, %s24_s19 }
   0x9   :  { %p356_p3 = scmp.ne.s32.totalorder %s24_s19, %s355_s27  ;;  %p361_p5 = scmp.lt.s32.totalorder %s355_s27, %s355_s27 }
   0xb   :  { %p362_p6 = por %p361_p5, %p360_p4 }
   0xd   :  { %p363_p7 = pnand %p362_p6, %p356_p3 }
   0xf   :  { %366 = shalt.err (!%p363_p7)
}
  0x10   :  { %s394_s28 = smov 128   ;;  %s395_s29 = smov 8  }
  0x11   :  { %29 = dma.hbm_to_vmem [thread:$0]  %s472_s3, 512, %s24_s19, [#allocation3], %s394_s28, %s394_s28, %s395_s29  }
  0x12   :  { %389 = dma.done.wait [#allocation3], 512  }
  0x13   :  { %390 = vsyncadd [#allocation3], 4294966784  ;;  %v396_v0 = vmov 0.0   ;;  %vm397_vm0 = vmmov 0   ;;  %v398_v1 = vmov 0.0|0.0   ;;  %vm41_vm1 = vcmask 1043456  }
  0x14   :  { %306 = vmatprep.subr.mxu0 %v396_v0  ;;  %308 = vmatprep.mubr.msk.f32.mxu0 %vm397_vm0, %v396_v0  ;;  %vm37_vm2 = vcmask 31744   ;;  %v36_v2 = vld [vmem:[%s471_s2] sm:$0xf]  ;;  %v123_v4 = vld [vmem:[#allocation2] sm:$0xff]  ;;  %v124_v5 = vld [vmem:[#allocation2 + $0x8] sm:$0xff]  ;;  %vm201_vm3 = vcmask 261120  }
  0x15   :  { %327 = vmatprep.subr.bf16.mxu1 %v398_v1  ;;  %324 = vmatprep.mubr.msk.f32.mxu1 %vm397_vm0, %v396_v0  ;;  %v35_v3 = vld [vmem:[%s469_s0] sm:$0xff]  ;;  %v328_v7 = vpack.c.bf16 %v124_v5, %v123_v4  ;;  %v125_v8 = vld [vmem:[#allocation2 + $0x10] sm:$0xff] }
  0x16   :  { %307 = vmatpush3.msk.msra.mxu0 %vm41_vm1, %v36_v2  ;;  %v127_v6 = vld [vmem:[%s473_s4] sm:$0xf]  ;;  %s399_s4 = smov [#allocation5]  }
  0x17   :  { %309 = vmatmul.mubr.msk.f32.vlgmr.msra.gmra.mrb[0].mxu0 %vm37_vm2, %v35_v3  ;;  %311 = vmatprep.subr.mxu0 %v396_v0  ;;  %v126_v9 = vld [vmem:[#allocation2 + $0x18] sm:$0xff]  ;;  %s282_s12 = sshll.u32 %s399_s4, 4  ;;  %s283_s12 = int_to_ptr.vmem [resolvable:$true] %s282_s12 }
  0x18   :  { %312 = vmatpush3.msk.msra.mxu0 %vm41_vm1, %v127_v6  ;;  %313 = vmatprep.mubr.msk.f32.mxu0 %vm397_vm0, %v396_v0  ;;  %v331_v10 = vpack.c.bf16 %v126_v9, %v125_v8  ;;  %v115_v11 = vld [vmem:[%s470_s1] sm:$0xff]  ;;  %s367_s1 = scalar_lea.vmem %s283_s12, 128  ;;  %p372_p9 = scmp.lt.s32.totalorder %s283_s12, %s283_s12 }
  0x19   :  { %329 = vmatpush3.bf16.msra.mxu1 %v328_v7  ;;  %v293_v12 = vmul.f32 -1.442695, %v115_v11  ;;  %p368_p8 = scmp.ne.s32.totalorder %s283_s12, %s367_s1  ;;  %p373_p10 = scmp.lt.s32.totalorder %s367_s1, %s367_s1 }
  0x1a   :  { %330 = vmatprep.subr.bf16.mxu1 %v398_v1 }
  0x1b   :  { %314 = vmatmul.mubr.msk.f32.vlgmr.msra.gmra.mrb[2].mxu0 %vm37_vm2, %v35_v3  ;;  %341 = vpow2.f32 %v293_v12  ;;  %p374_p11 = por %p373_p10, %p372_p9 }
  0x1d   :  { %332 = vmatpush3.bf16.msra.mxu1 %v331_v10  ;;  %p375_p12 = pnand %p374_p11, %p368_p8 }
  0x25   :  { %v342_v13 = vpop.eup %341 }
  0x26   :  { %v119_v14 = vadd.f32 1.0, %v342_v13 }
  0x28   :  { %343 = vrcp.f32 %v119_v14 }
  0x32   :  { %v344_v15 = vpop.eup %343 }
  0xea   :  { %v111_v16 = vpop.f32.mrb[0].mxu0 }
  0xeb   :  { %v122_v17 = vmul.f32 %v344_v15, %v111_v16  ;;  %v310_v18 = vpop.f32.mrb[1].mxu0 }
  0xed   :  { %325 = vmatmul.mubr.msk.f32.vlgmr.msra.gmra.mrb[0].mxu1 %vm201_vm3, %v122_v17 }
  0xee   :  { %v197_v19 = vpop.f32.mrb[2].mxu0 }
  0xef   :  { %v315_v20 = vpop.f32.mrb[3].mxu0 }
 0x1c0   :  { %v271_v21 = vpop.f32.mrb[0].mxu1 }
 0x1c1   :  { %v272_v22 = vadd.f32 %v271_v21, %v197_v19  ;;  %v326_v23 = vpop.f32.mrb[1].mxu1 }
 0x1c3   :  { %275 = vst.msk [vmem:[#allocation5] sm:$0xff] %vm201_vm3, %v272_v22 }
 0x1c4   :  { %378 = shalt.err (!%p375_p12)
}
 0x1c5   :  { %s379_s15 = scalar_lea.hbm %s474_s5, 128 }
 0x1c6   :  { %p380_p13 = scmp.ne.s32.totalorder %s474_s5, %s379_s15  ;;  %p383_p0 = scmp.lt.u32.totalorder %s379_s15, %s474_s5 }
 0x1c8   :  { %p385_p1 = pnand %p383_p0, %p380_p13 }
 0x1ca   :  { %388 = shalt.err (!%p385_p1)
}
 0x1cb   :  { %285 = dma.vmem_to_hbm [thread:$0]  %s283_s12, 128, %s474_s5, [#allocation4]  }
 0x1cc   :  { %391 = dma.done.wait [#allocation4], 128  }
 0x1cd   :  { %392 = vsyncadd [#allocation4], 4294967168 }
 0x1ce   :  { %289 = vsyncpa [#allocation3], 1 }
 0x1cf   :  { %290 = vsyncpa [#allocation4], 1 }

</bundles_post_ra>
